<compile_context>
chip_gen: v7x
topology: tpu7x:2x2x1
jax: 0.10.0
libtpu: 0.0.40
codegen_flags: <defaults>
</compile_context>

<pallas_src>
import math
import functools

import jax
import jax.numpy as jnp
from jax import lax
from jax.experimental import pallas as pl
from jax.experimental.pallas import tpu as pltpu


_VMEM_LIMIT = 32 * 1024 * 1024  # actual per-kernel use is a few MiB


def _round_up(x, m):
    return ((x + m - 1) // m) * m


def _plan_dim(dim, target):
    """(tile, padded_dim) for a matmul dim: full dim if small, else `target`
    with zero padding up to a multiple of `target` (keeps the tiled regime
    instead of one giant block)."""
    if dim <= target:
        return dim, dim
    if dim % target == 0:
        return target, dim
    return target, _round_up(dim, target)


def _pick_tile(dim, target, align=8):
    """Largest tile <= target that divides `dim` and is a multiple of `align`;
    falls back to the full dim (block == full dim is always legal)."""
    if dim <= target:
        return dim
    t = (target // align) * align
    while t >= align:
        if dim % t == 0:
            return t
        t -= align
    return dim


# ----------------------------------------------------------------------------
# Tiled linear kernel:  o = x @ w + b
# ----------------------------------------------------------------------------
def _linear_kernel(x_ref, w_ref, b_ref, o_ref, acc_ref):
    @pl.when(pl.program_id(2) == 0)
    def _():
        acc_ref[...] = jnp.zeros(acc_ref.shape, acc_ref.dtype)

    acc_ref[...] += jnp.dot(x_ref[...], w_ref[...],
                            preferred_element_type=jnp.float32)

    @pl.when(pl.program_id(2) == pl.num_programs(2) - 1)
    def _():
        o_ref[...] = (acc_ref[...] + b_ref[...].astype(jnp.float32)).astype(o_ref.dtype)


def _linear(x2d, w, b, *, tm=512, tn=512, tk=512):
    """x2d: (M, K), w: (K, N), b: (N,) -> (M, N), tiled Pallas matmul."""
    M, K = x2d.shape
    N = w.shape[1]
    tm, Mp = _plan_dim(M, tm)
    tn, Np = _plan_dim(N, tn)
    tk, Kp = _plan_dim(K, tk)

    if Mp != M or Kp != K:
        x2d = jnp.pad(x2d, ((0, Mp - M), (0, Kp - K)))
    if Kp != K or Np != N:
        w = jnp.pad(w, ((0, Kp - K), (0, Np - N)))
    b2 = b.reshape(1, N)
    if Np != N:
        b2 = jnp.pad(b2, ((0, 0), (0, Np - N)))

    grid = (Mp // tm, Np // tn, Kp // tk)
    out = pl.pallas_call(
        _linear_kernel,
        grid=grid,
        in_specs=[
            pl.BlockSpec((tm, tk), lambda i, j, k: (i, k)),
            pl.BlockSpec((tk, tn), lambda i, j, k: (k, j)),
            pl.BlockSpec((1, tn), lambda i, j, k: (0, j)),
        ],
        out_specs=pl.BlockSpec((tm, tn), lambda i, j, k: (i, j)),
        out_shape=jax.ShapeDtypeStruct((Mp, Np), x2d.dtype),
        scratch_shapes=[pltpu.VMEM((tm, tn), jnp.float32)],
        compiler_params=pltpu.CompilerParams(
            dimension_semantics=("parallel", "parallel", "arbitrary"),
            vmem_limit_bytes=_VMEM_LIMIT,
        ),
    )(x2d, w, b2)
    if Mp != M or Np != N:
        out = out[:M, :N]
    return out


# ----------------------------------------------------------------------------
# Flash-style causal GQA attention kernel
# ----------------------------------------------------------------------------
def _gqa_flash_kernel(q_ref, k_ref, v_ref, o_ref, m_ref, l_ref, acc_ref,
                      *, tq, tkv, hpg, exp_dtype):
    """One (batch, group, q-tile) online-softmax step over one kv tile.

    q_ref / o_ref : (hpg, tq, hs)  -- all query heads of the group, stacked.
    k_ref / v_ref : (tkv, hs)      -- the group's shared KV tile.
    m/l/acc scratch persists across the kv grid axis (innermost, "arbitrary").
    The softmax scale is already folded into the Q projection weights.
    """
    ki = pl.program_id(3)
    nk = pl.num_programs(3)
    q_start = pl.program_id(2) * tq
    kv_start = ki * tkv
    hs = q_ref.shape[-1]
    M2 = hpg * tq

    @pl.when(ki == 0)
    def _():
        m_ref[...] = jnp.full(m_ref.shape, -jnp.inf, m_ref.dtype)
        l_ref[...] = jnp.zeros(l_ref.shape, l_ref.dtype)
        acc_ref[...] = jnp.zeros(acc_ref.shape, acc_ref.dtype)

    def qk_scores():
        # Stack the group's heads along the sublane (M) axis; input dtype
        # feeds the MXU directly, accumulation in f32; head dim contracted
        # via dot_general (no materialized k.T).
        q = q_ref[...].reshape(M2, hs)
        return lax.dot_general(q, k_ref[...], (((1,), (1,)), ((), ())),
                               preferred_element_type=jnp.float32)   # (M2, tkv)

    def online_update(s):
        v = v_ref[...]
        m_prev = m_ref[...]
        m_new = jnp.maximum(m_prev, jnp.max(s, axis=-1, keepdims=True))
        alpha = jnp.exp(m_prev - m_new)
        # bf16 exp only when activations are bf16 (2x EUP rate on v6e/v7x);
        # stats (m, l) and the l-sum stay f32.
        p = jnp.exp((s - m_new).astype(exp_dtype))
        l_ref[...] = alpha * l_ref[...] + jnp.sum(
            p.astype(jnp.float32), axis=-1, keepdims=True)
        acc_ref[...] = alpha * acc_ref[...] + jnp.dot(
            p.astype(v.dtype), v, preferred_element_type=jnp.float32)
        m_ref[...] = m_new

    # Tile classification (all positions are static offsets of program ids):
    #   contributes : some k_pos <= some q_pos  (otherwise fully above diagonal)
    #   needs_mask  : some k_pos  > some q_pos  (tile straddles the diagonal)
    contributes = kv_start <= q_start + (tq - 1)
    needs_mask = (kv_start + (tkv - 1)) > q_start

    @pl.when(jnp.logical_and(contributes, jnp.logical_not(needs_mask)))
    def _():
        # Fully below the diagonal: no mask work at all.
        online_update(qk_scores())

    @pl.when(jnp.logical_and(contributes, needs_mask))
    def _():
        s = qk_scores()
        row = lax.broadcasted_iota(jnp.int32, (M2, tkv), 0)
        col = lax.broadcasted_iota(jnp.int32, (M2, tkv), 1)
        q_pos = q_start + row % tq        # head-major stacked rows
        k_pos = kv_start + col
        # Finite fill avoids NaN for rows that are fully masked in this tile.
        s = jnp.where(k_pos <= q_pos, s, -1e30)
        online_update(s)

    @pl.when(ki == nk - 1)
    def _():
        # Normalize once per q tile (exact reciprocal: once per tile, free).
        inv_l = pl.reciprocal(l_ref[...], approx=False)
        out = acc_ref[...] * inv_l
        o_ref[...] = out.reshape(o_ref.shape).astype(o_ref.dtype)


def _gqa_attention(q, k, v, *, kv_slab_cols=None, tq=256, tkv=256):
    """q: (B, G, hpg, T, hs) -> (B, G, hpg, T, hs).

    If kv_slab_cols is None, k/v are (B, G, T, hs).
    Otherwise k/v are the fused QKV slab (B*T, ncols) and kv_slab_cols =
    (k_col_block, v_col_block) are the per-group column-block offsets (in
    units of hs) of K and V inside that slab — K/V tiles are then DMA'd
    straight from the projection output with no transposed copies in HBM.
    """
    B, G, hpg, T, hs = q.shape
    tq = _pick_tile(T, tq)
    tkv = _pick_tile(T, tkv)
    exp_dtype = jnp.bfloat16 if q.dtype == jnp.bfloat16 else jnp.float32

    kernel = functools.partial(_gqa_flash_kernel, tq=tq, tkv=tkv, hpg=hpg,
                               exp_dtype=exp_dtype)

    def kv_block(qi, ki):
        # Clamp to the last causally relevant kv block: above-diagonal steps
        # return the SAME block index as the previous step, so the BlockSpec
        # pipeline issues no HBM DMA for tiles the pl.when guard skips.
        return jnp.minimum(ki, (qi * tq + tq - 1) // tkv)

    grid = (B, G, T // tq, T // tkv)
    q_spec = pl.BlockSpec((None, None, hpg, tq, hs),
                          lambda b, g, qi, ki: (b, g, 0, qi, 0))
    if kv_slab_cols is None:
        k_spec = pl.BlockSpec((None, None, tkv, hs),
                              lambda b, g, qi, ki: (b, g, kv_block(qi, ki), 0))
        v_spec = k_spec
    else:
        kcol, vcol = kv_slab_cols
        k_spec = pl.BlockSpec(
            (tkv, hs),
            lambda b, g, qi, ki: (b * (T // tkv) + kv_block(qi, ki), kcol + g))
        v_spec = pl.BlockSpec(
            (tkv, hs),
            lambda b, g, qi, ki: (b * (T // tkv) + kv_block(qi, ki), vcol + g))

    return pl.pallas_call(
        kernel,
        grid=grid,
        in_specs=[q_spec, k_spec, v_spec],
        out_specs=q_spec,
        out_shape=jax.ShapeDtypeStruct((B, G, hpg, T, hs), q.dtype),
        scratch_shapes=[
            pltpu.VMEM((hpg * tq, 1), jnp.float32),    # m (running max)
            pltpu.VMEM((hpg * tq, 1), jnp.float32),    # l (running denom)
            pltpu.VMEM((hpg * tq, hs), jnp.float32),   # acc (unnormalized out)
        ],
        compiler_params=pltpu.CompilerParams(
            dimension_semantics=("parallel", "parallel", "parallel", "arbitrary"),
            vmem_limit_bytes=_VMEM_LIMIT,
        ),
    )(q, k, v)


# ----------------------------------------------------------------------------
# Module-equivalent forward
# ----------------------------------------------------------------------------
def gqa_forward(x, params, n_head, n_query_groups):
    """Equivalent of GroupQueryAttention.forward (eval mode, dropout=0)."""
    B, T, C = x.shape
    hs = C // n_head
    G = n_query_groups
    hpg = n_head // G
    kv_dim = hs * G
    scale = 1.0 / math.sqrt(hs)

    x2d = x.reshape(B * T, C)

    # Fused QKV projection (single pass over x). The softmax 1/sqrt(hs) is
    # folded into the Q weights/bias here, at zero runtime cost.
    w_qkv = jnp.concatenate([params["wq"] * scale, params["wk"], params["wv"]], axis=1)
    b_qkv = jnp.concatenate([params["bq"] * scale, params["bk"], params["bv"]], axis=0)
    qkv = _linear(x2d, w_qkv, b_qkv)                             # (B*T, C + 2*kv_dim)

    # Q needs head-major stacking (all hpg heads of a group share one KV tile).
    q = qkv[:, :C].reshape(B, T, G, hpg, hs).transpose(0, 2, 3, 1, 4)  # (B,G,hpg,T,hs)

    if hs % 128 == 0 and T % 8 == 0:
        # Lane-aligned head size: read K/V tiles straight from the QKV slab
        # (group g's K columns start at block n_head+g, V at n_head+G+g).
        y = _gqa_attention(q, qkv, qkv, kv_slab_cols=(n_head, n_head + G))
    else:
        # Fallback layout for small / unaligned head sizes.
        k = qkv[:, C:C + kv_dim].reshape(B, T, G, hs).transpose(0, 2, 1, 3)
        v = qkv[:, C + kv_dim:].reshape(B, T, G, hs).transpose(0, 2, 1, 3)
        y = _gqa_attention(q, k, v)

    y = y.transpose(0, 3, 1, 2, 4).reshape(B * T, C)             # (B*T, C)
    y = _linear(y, params["wo"], params["bo"])
    # TODO(synk): attention dropout / resid_dropout are identity in eval mode.
    return y.reshape(B, T, C)


# ----------------------------------------------------------------------------
# Deterministic parameter init (PyTorch nn.Linear-style uniform init)
# ----------------------------------------------------------------------------
def init_params(key, n_embd, n_head, n_query_groups, dtype=jnp.float32):
    head_size = n_embd // n_head
    kv_dim = head_size * n_query_groups

    def linear_init(k, fan_in, fan_out):
        kw, kb = jax.random.split(k)
        bound = 1.0 / math.sqrt(fan_in)
        # stored transposed: (in, out), so forward is x @ w + b
        w = jax.random.uniform(kw, (fan_in, fan_out), dtype, -bound, bound)
        b = jax.random.uniform(kb, (fan_out,), dtype, -bound, bound)
        return w, b

    kq, kk, kv, ko = jax.random.split(key, 4)
    wq, bq = linear_init(kq, n_embd, n_embd)
    wk, bk = linear_init(kk, n_embd, kv_dim)
    wv, bv = linear_init(kv, n_embd, kv_dim)
    wo, bo = linear_init(ko, n_embd, n_embd)
    return dict(wq=wq, bq=bq, wk=wk, bk=bk, wv=wv, bv=bv, wo=wo, bo=bo)


# ----------------------------------------------------------------------------
# Pure-JAX reference for sanity check
# ----------------------------------------------------------------------------
def gqa_reference(x, params, n_head, n_query_groups):
    B, T, C = x.shape
    hs = C // n_head
    hpg = n_head // n_query_groups

    q = x @ params["wq"] + params["bq"]
    k = x @ params["wk"] + params["bk"]
    v = x @ params["wv"] + params["bv"]

    q = q.reshape(B, T, n_head, hs).transpose(0, 2, 1, 3)
    k = k.reshape(B, T, n_query_groups, hs).transpose(0, 2, 1, 3)
    v = v.reshape(B, T, n_query_groups, hs).transpose(0, 2, 1, 3)
    k = jnp.repeat(k, hpg, axis=1)
    v = jnp.repeat(v, hpg, axis=1)

    att = jnp.einsum("bhqd,bhkd->bhqk", q, k) / math.sqrt(hs)
    mask = jnp.tril(jnp.ones((T, T), bool))
    att = jnp.where(mask[None, None], att, -jnp.inf)
    att = jax.nn.softmax(att, axis=-1)
    y = jnp.einsum("bhqk,bhkd->bhqd", att, v)
    y = y.transpose(0, 2, 1, 3).reshape(B, T, C)
    return y @ params["wo"] + params["bo"]


if __name__ == "__main__":
    def run_case(B, T, n_embd, n_head, n_query_groups):
        key = jax.random.PRNGKey(0)
        kp, kx = jax.random.split(key)
        params = init_params(kp, n_embd, n_head, n_query_groups)
        x = jax.random.normal(kx, (B, T, n_embd), jnp.float32)
        y = jax.block_until_ready(gqa_forward(x, params, n_head, n_query_groups))
        assert y.shape == (B, T, n_embd)
        y_ref = gqa_reference(x, params, n_head, n_query_groups)
        err = float(jnp.max(jnp.abs(y - y_ref)))
        assert err < 2e-3, f"mismatch vs reference: {err}"

    # Small config consistent with the module's asserts (hs=8 -> fallback KV path).
    run_case(B=2, T=8, n_embd=32, n_head=4, n_query_groups=2)
    # hs=128 config: exercises the direct-slab KV path, causal tile skipping
    # (clamped kv index_map) and multi-tile online softmax (T=512, tq=tkv=256).
    run_case(B=1, T=512, n_embd=256, n_head=2, n_query_groups=1)

    print("KERNEL_OK")
</pallas_src>

<mosaic_0001>
module attributes {stable_mosaic.version = 11 : i64} {
  func.func @_linear_kernel(%arg0: i32, %arg1: i32, %arg2: i32, %arg3: memref<16x32xf32, #tpu.memory_space<vmem>>, %arg4: memref<32x64xf32, #tpu.memory_space<vmem>>, %arg5: memref<1x64xf32, #tpu.memory_space<vmem>>, %arg6: memref<16x64xf32, #tpu.memory_space<vmem>>, %arg7: memref<16x64xf32, #tpu.memory_space<vmem>>) attributes {dimension_semantics = [#tpu.dimension_semantics<parallel>, #tpu.dimension_semantics<parallel>, #tpu.dimension_semantics<arbitrary>], iteration_bounds = array<i64: 1, 1, 1>, scalar_prefetch = 0 : i64, scratch_operands = 1 : i64, tpu.core_type = #tpu.core_type<tc>, window_params = [{transform_indices = @transform_0, window_bounds = array<i64: 16, 32>}, {transform_indices = @transform_1, window_bounds = array<i64: 32, 64>}, {transform_indices = @transform_2, window_bounds = array<i64: 1, 64>}, {transform_indices = @transform_3, window_bounds = array<i64: 16, 64>}]} {
    %c0_i32 = arith.constant 0 : i32
    %0 = arith.cmpi eq, %arg2, %c0_i32 : i32
    %1 = arith.extui %0 : i1 to i32
    %c0_i32_0 = arith.constant 0 : i32
    %2 = arith.cmpi ne, %1, %c0_i32_0 : i32
    scf.if %2 {
      %cst_10 = arith.constant 0.000000e+00 : f32
      %12 = vector.broadcast %cst_10 : f32 to vector<16x64xf32>
      %c0_11 = arith.constant 0 : index
      %c0_12 = arith.constant 0 : index
      %13 = vector.load %arg7[%c0_11, %c0_12] : memref<16x64xf32, #tpu.memory_space<vmem>>, vector<16x64xf32>
      tpu.vector_store %arg7[%c0_11, %c0_12], %12 {strides = array<i32>} : memref<16x64xf32, #tpu.memory_space<vmem>>, vector<16x64xf32>,
    } else {
    }
    %c0 = arith.constant 0 : index
    %c0_1 = arith.constant 0 : index
    %3 = vector.load %arg7[%c0, %c0_1] : memref<16x64xf32, #tpu.memory_space<vmem>>, vector<16x64xf32>
    %c0_2 = arith.constant 0 : index
    %c0_3 = arith.constant 0 : index
    %4 = vector.load %arg3[%c0_2, %c0_3] : memref<16x32xf32, #tpu.memory_space<vmem>>, vector<16x32xf32>
    %c0_4 = arith.constant 0 : index
    %c0_5 = arith.constant 0 : index
    %5 = vector.load %arg4[%c0_4, %c0_5] : memref<32x64xf32, #tpu.memory_space<vmem>>, vector<32x64xf32>
    %cst = arith.constant dense<0.000000e+00> : vector<16x64xf32>
    %6 = tpu.matmul %4, %5, %cst {dimension_numbers = #tpu.dot_dimension_numbers<[1], [0], [0], [1], [0, 0, 1, 1], [], []>} : vector<16x32xf32>, vector<32x64xf32>, vector<16x64xf32> -> vector<16x64xf32>
    %7 = arith.addf %3, %6 : vector<16x64xf32>
    %c0_6 = arith.constant 0 : index
    %c0_7 = arith.constant 0 : index
    %8 = vector.load %arg7[%c0_6, %c0_7] : memref<16x64xf32, #tpu.memory_space<vmem>>, vector<16x64xf32>
    tpu.vector_store %arg7[%c0_6, %c0_7], %7 {strides = array<i32>} : memref<16x64xf32, #tpu.memory_space<vmem>>, vector<16x64xf32>,
    %c0_i32_8 = arith.constant 0 : i32
    %9 = arith.cmpi eq, %arg2, %c0_i32_8 : i32
    %10 = arith.extui %9 : i1 to i32
    %c0_i32_9 = arith.constant 0 : i32
    %11 = arith.cmpi ne, %10, %c0_i32_9 : i32
    scf.if %11 {
      %c0_10 = arith.constant 0 : index
      %c0_11 = arith.constant 0 : index
      %12 = vector.load %arg7[%c0_10, %c0_11] : memref<16x64xf32, #tpu.memory_space<vmem>>, vector<16x64xf32>
      %c0_12 = arith.constant 0 : index
      %c0_13 = arith.constant 0 : index
      %13 = vector.load %arg5[%c0_12, %c0_13] : memref<1x64xf32, #tpu.memory_space<vmem>>, vector<1x64xf32>
      %14 = vector.broadcast %13 : vector<1x64xf32> to vector<16x64xf32>
      %15 = arith.addf %12, %14 : vector<16x64xf32>
      %c0_14 = arith.constant 0 : index
      %c0_15 = arith.constant 0 : index
      %16 = vector.load %arg6[%c0_14, %c0_15] : memref<16x64xf32, #tpu.memory_space<vmem>>, vector<16x64xf32>
      tpu.vector_store %arg6[%c0_14, %c0_15], %15 {strides = array<i32>} : memref<16x64xf32, #tpu.memory_space<vmem>>, vector<16x64xf32>,
    } else {
    }
    return
  }
  func.func @transform_0(%arg0: i32, %arg1: i32, %arg2: i32) -> (i32, i32) {
    %c0_i32 = arith.constant 0 : i32
    return %arg0, %arg2 : i32, i32
  }
  func.func @transform_1(%arg0: i32, %arg1: i32, %arg2: i32) -> (i32, i32) {
    %c0_i32 = arith.constant 0 : i32
    return %arg2, %arg1 : i32, i32
  }
  func.func @transform_2(%arg0: i32, %arg1: i32, %arg2: i32) -> (i32, i32) {
    %c0_i32 = arith.constant 0 : i32
    %c0_i32_0 = arith.constant 0 : i32
    return %c0_i32, %arg1 : i32, i32
  }
  func.func @transform_3(%arg0: i32, %arg1: i32, %arg2: i32) -> (i32, i32) {
    %c0_i32 = arith.constant 0 : i32
    return %arg0, %arg1 : i32, i32
  }
}

</mosaic_0001>

<bundles_post_ra>
// kernel: tpu_custom_call.1
= control target key start
LH: loop header
LB: loop body
LE: loop exit
PB: predicated region body
PF: predicated region fallthrough
CT: control target
= control target key end

     0   :  { %8 = vsyncpa [#allocation4], 0  ;;  %s365_s0 = inlined_call_operand.hbm [shape: f32[16,32], index: 0, kind: input, shape index: {}]   ;;  %s366_s1 = inlined_call_operand.hbm [shape: f32[32,64], index: 1, kind: input, shape index: {}]   ;;  %s367_s2 = inlined_call_operand.vmem [shape: f32[1,64], index: 2, kind: input, shape index: {}]   ;;  %s368_s3 = inlined_call_operand.hbm [shape: f32[16,64], index: 3, kind: output, shape index: {}]  }
   0x1   :  { %9 = vsyncpa [#allocation7], 0 }
   0x2   :  { %10 = vsyncpa [#allocation5], 0  ;;  %s285_s12 = smov [#allocation3]   ;;  %s213_s16 = scalar_lea.hbm %s365_s0, 256 }
   0x3   :  { %s16_s13 = sshll.u32 %s285_s12, 4  ;;  %p214_p0 = scmp.ne.s32.totalorder %s365_s0, %s213_s16  ;;  %s17_s13 = int_to_ptr.vmem [resolvable:$true] %s16_s13 }
   0x4   :  { %p217_p1 = scmp.lt.u32.totalorder %s213_s16, %s365_s0 }
   0x6   :  { %p219_p2 = pnand %p217_p1, %p214_p0 }
   0x8   :  { %222 = shalt.err (!%p219_p2)
}
   0x9   :  { %s223_s21 = scalar_lea.vmem %s17_s13, 256  ;;  %p228_p4 = scmp.lt.s32.totalorder %s17_s13, %s17_s13 }
   0xa   :  { %p224_p3 = scmp.ne.s32.totalorder %s17_s13, %s223_s21  ;;  %p229_p5 = scmp.lt.s32.totalorder %s223_s21, %s223_s21 }
   0xc   :  { %p230_p6 = por %p229_p5, %p228_p4 }
   0xe   :  { %p231_p7 = pnand %p230_p6, %p224_p3 }
  0x10   :  { %234 = shalt.err (!%p231_p7)
}
  0x11   :  { %s286_s22 = smov 128   ;;  %s287_s23 = smov 8  }
  0x12   :  { %22 = dma.hbm_to_vmem [thread:$0]  %s365_s0, 256, %s17_s13, [#allocation4], %s286_s22, %s286_s22, %s287_s23  }
  0x13   :  { %s288_s26 = smov [#allocation6]   ;;  %s235_s30 = scalar_lea.hbm %s366_s1, 512 }
  0x14   :  { %s28_s27 = sshll.u32 %s288_s26, 4  ;;  %p236_p8 = scmp.ne.s32.totalorder %s366_s1, %s235_s30  ;;  %s29_s27 = int_to_ptr.vmem [resolvable:$true] %s28_s27 }
  0x15   :  { %p239_p9 = scmp.lt.u32.totalorder %s235_s30, %s366_s1 }
  0x17   :  { %p241_p10 = pnand %p239_p9, %p236_p8 }
  0x19   :  { %244 = shalt.err (!%p241_p10)
}
  0x1a   :  { %s245_s8 = scalar_lea.vmem %s29_s27, 512  ;;  %p250_p12 = scmp.lt.s32.totalorder %s29_s27, %s29_s27 }
  0x1b   :  { %p246_p11 = scmp.ne.s32.totalorder %s29_s27, %s245_s8  ;;  %p251_p13 = scmp.lt.s32.totalorder %s245_s8, %s245_s8 }
  0x1d   :  { %p252_p0 = por %p251_p13, %p250_p12 }
  0x1f   :  { %p253_p1 = pnand %p252_p0, %p246_p11 }
  0x21   :  { %256 = shalt.err (!%p253_p1)
}
  0x22   :  { %34 = dma.hbm_to_vmem [thread:$0]  %s366_s1, 512, %s29_s27, [#allocation7], %s286_s22, %s286_s22, %s287_s23  }
  0x23   :  { %279 = dma.done.wait [#allocation4], 256  }
  0x24   :  { %280 = vsyncadd [#allocation4], 4294967040 }
  0x25   :  { %281 = dma.done.wait [#allocation7], 512  }
  0x26   :  { %282 = vsyncadd [#allocation7], 4294966784  ;;  %vm47_vm0 = vcmask 523264   ;;  %v289_v0 = vmov 0.0   ;;  %vm58_vm1 = vcmask 261120   ;;  %v54_v1 = vld [vmem:[#allocation6] sm:$0xff] }
  0x27   :  { %49 = vst.msk [vmem:[#allocation2 + $0x8] sm:$0xff] %vm47_vm0, %v289_v0  ;;  %48 = vst.msk [vmem:[#allocation2] sm:$0xff] %vm47_vm0, %v289_v0  ;;  %v55_v2 = vld [vmem:[#allocation6 + $0x8] sm:$0xff]  ;;  %v56_v3 = vld [vmem:[#allocation6 + $0x10] sm:$0xff]  ;;  %s290_s11 = smov [#allocation8]  }
  0x28   :  { %v199_v4 = vpack.c.bf16 %v55_v2, %v54_v1  ;;  %v57_v5 = vld [vmem:[#allocation6 + $0x18] sm:$0xff]  ;;  %v52_v6 = vld [vmem:[#allocation3] sm:$0xff]  ;;  %v181_v15 = vld [vmem:[%s367_s2] ss:$0 sm:$0xff]  ;;  %s166_s12 = sshll.u32 %s290_s11, 4  ;;  %s167_s12 = int_to_ptr.vmem [resolvable:$true] %s166_s12 }
  0x29   :  { %v203_v7 = vpack.c.bf16 %v57_v5, %v56_v3  ;;  %196 = vmatprep.mubr.msk.f32.mxu0 %vm58_vm1, %v52_v6  ;;  %v53_v8 = vld [vmem:[#allocation3 + $0x8] sm:$0xff]  ;;  %s257_s13 = scalar_lea.vmem %s167_s12, 256  ;;  %p262_p3 = scmp.lt.s32.totalorder %s167_s12, %s167_s12 }
  0x2a   :  { %200 = vmatprep.subr.bf16.mxu0 %v199_v4  ;;  %p258_p2 = scmp.ne.s32.totalorder %s167_s12, %s257_s13  ;;  %p263_p4 = scmp.lt.s32.totalorder %s257_s13, %s257_s13 }
  0x2b   :  { %202 = vmatpush3.bf16.msra.mxu0 %v199_v4 }
  0x2c   :  { %204 = vmatprep.subr.bf16.mxu0 %v203_v7  ;;  %p264_p5 = por %p263_p4, %p262_p3 }
  0x2e   :  { %v51_v9 = vld [vmem:[#allocation2 + $0x8] sm:$0xff]  ;;  %v50_v10 = vld [vmem:[#allocation2] sm:$0xff]  ;;  %p265_p6 = pnand %p264_p5, %p258_p2 }
  0x2f   :  { %206 = vmatpush3.bf16.msra.mxu0 %v203_v7 }
  0x32   :  { %197 = vmatmul.mubr.msk.f32.vlgmr.msra.gmra.mrb[0].mxu0 %vm58_vm1, %v53_v8 }
 0x105   :  { %v198_v11 = vpop.f32.mrb[0].mxu0 }
 0x106   :  { %v141_v12 = vadd.f32 %v198_v11, %v51_v9  ;;  %v131_v13 = vpop.f32.mrb[1].mxu0 }
 0x107   :  { %v140_v14 = vadd.f32 %v131_v13, %v50_v10 }
 0x108   :  { %144 = vst.msk [vmem:[#allocation2 + $0x8] sm:$0xff] %vm47_vm0, %v141_v12 }
 0x109   :  { %143 = vst.msk [vmem:[#allocation2] sm:$0xff] %vm47_vm0, %v140_v14 }
 0x10f   :  { %v149_v16 = vld [vmem:[#allocation2 + $0x8] sm:$0xff] }
 0x110   :  { %v148_v17 = vld [vmem:[#allocation2] sm:$0xff]  ;;  %v158_v18 = vadd.f32 %v181_v15, %v149_v16 }
 0x111   :  { %v157_v19 = vadd.f32 %v181_v15, %v148_v17 }
 0x112   :  { %160 = vst.msk [vmem:[#allocation8 + $0x8] sm:$0xff] %vm47_vm0, %v158_v18 }
 0x113   :  { %159 = vst.msk [vmem:[#allocation8] sm:$0xff] %vm47_vm0, %v157_v19 }
 0x114   :  { %268 = shalt.err (!%p265_p6)
}
 0x115   :  { %s269_s15 = scalar_lea.hbm %s368_s3, 256 }
 0x116   :  { %p270_p7 = scmp.ne.s32.totalorder %s368_s3, %s269_s15  ;;  %p273_p8 = scmp.lt.u32.totalorder %s269_s15, %s368_s3 }
 0x118   :  { %p275_p9 = pnand %p273_p8, %p270_p7 }
 0x11a   :  { %278 = shalt.err (!%p275_p9)
}
 0x11b   :  { %172 = dma.vmem_to_hbm [thread:$0]  %s167_s12, 256, %s368_s3, [#allocation5], %s286_s22, %s286_s22, %s287_s23  }
 0x11c   :  { %283 = dma.done.wait [#allocation5], 256  }
 0x11d   :  { %284 = vsyncadd [#allocation5], 4294967040 }
 0x11e   :  { %176 = vsyncpa [#allocation4], 1 }
 0x11f   :  { %177 = vsyncpa [#allocation7], 1 }
 0x120   :  { %178 = vsyncpa [#allocation5], 1 }

</bundles_post_ra>
